<compile_context>
chip_gen: v7x
topology: tpu7x:2x2x1
jax: 0.10.0
libtpu: 0.0.40
codegen_flags: <defaults>
</compile_context>

<pallas_src>
import functools

import jax
import jax.numpy as jnp
from jax.experimental import pallas as pl
from jax.experimental.pallas import tpu as pltpu


def _round_up(x, m):
    return ((x + m - 1) // m) * m


def critic_kernel(state_t_ref, action_t_ref,
                  w1ts_ref, w1ta_ref, b1_ref,
                  w2t_ref, b2_ref,
                  w3t_ref, b3_ref,
                  w4_ref, b4_ref,
                  o_ref):
    """Transposed formulation: features on sublanes, batch on lanes (lane-dense)."""
    s_bf = state_t_ref[...].astype(jnp.bfloat16)     # [S, bb]
    a_bf = action_t_ref[...].astype(jnp.bfloat16)    # [A, bb]

    # Layer 1: Linear(S+A -> 256) + ReLU. cat on the feature axis == split matmuls:
    #   W1^T @ [state; action]^T = W1s^T @ state^T + W1a^T @ action^T
    h = (jnp.dot(w1ts_ref[...], s_bf, preferred_element_type=jnp.float32)
         + jnp.dot(w1ta_ref[...], a_bf, preferred_element_type=jnp.float32)
         + b1_ref[...])                               # [256, bb] f32
    # ReLU in f32 (v5e has no bf16 VPU), then narrow for the next MXU pass.
    h = jnp.maximum(h, 0.0).astype(jnp.bfloat16)

    # Layer 2: Linear(256 -> 128) + ReLU.
    h = jnp.dot(w2t_ref[...], h, preferred_element_type=jnp.float32) + b2_ref[...]
    h = jnp.maximum(h, 0.0).astype(jnp.bfloat16)      # [128, bb]

    # Layer 3: Linear(128 -> 64) + ReLU.
    h = jnp.dot(w3t_ref[...], h, preferred_element_type=jnp.float32) + b3_ref[...]
    h = jnp.maximum(h, 0.0)                           # [64, bb] f32

    # Layer 4: Linear(64 -> 1) as VPU multiply + sublane reduce -> lane-dense (1, bb).
    out = jnp.sum(h * w4_ref[...], axis=0, keepdims=True) + b4_ref[0, 0]
    o_ref[...] = out.astype(o_ref.dtype)


def prepare_critic_params(params, state_dim):
    """One-time transform of natural-layout params into the kernel layout.

    Hoisted out of critic_forward so the W1 split, transposes, bf16 casts and
    reshapes are NOT re-executed before every kernel launch (matters for
    high-rate, small-batch RL rollouts).
    """
    w1, b1, w2, b2, w3, b3, w4, b4 = params
    return (
        jnp.asarray(w1[:state_dim].T, jnp.bfloat16),   # [256, S]
        jnp.asarray(w1[state_dim:].T, jnp.bfloat16),   # [256, A]
        jnp.asarray(b1.reshape(-1, 1), jnp.float32),   # [256, 1]
        jnp.asarray(w2.T, jnp.bfloat16),               # [128, 256]
        jnp.asarray(b2.reshape(-1, 1), jnp.float32),   # [128, 1]
        jnp.asarray(w3.T, jnp.bfloat16),               # [64, 128]
        jnp.asarray(b3.reshape(-1, 1), jnp.float32),   # [64, 1]
        jnp.asarray(w4.reshape(-1, 1), jnp.float32),   # [64, 1]  (f32 for VPU reduce)
        jnp.asarray(b4.reshape(1, 1), jnp.float32),    # (1, 1)   SMEM scalar
    )


@functools.partial(jax.jit, static_argnames=("block_b",))
def critic_forward(state, action, prepared_params, block_b=1024):
    """state: [B, state_dim], action: [B, action_dim] -> [B, 1].

    block_b: max batch tile (256-aligned; 256 is also a 128 multiple for v5e).
    """
    B, state_dim = state.shape
    action_dim = action.shape[1]
    (w1ts, w1ta, b1c, w2t, b2c, w3t, b3c, w4c, b4s) = prepared_params

    # Lane-dense layout: features on sublanes, batch on lanes.
    state_t = state.T       # [S, B]
    action_t = action.T     # [A, B]

    # Batch tile: big (amortizes ~0.35 us/grid-step), 256-aligned, but capped so the
    # grid keeps >= 2-4 steps when the batch allows it (v7x has 2 TensorCores).
    if B <= 256:
        bb = B                                            # single full-dim block
    else:
        tile = max(256, (block_b // 256) * 256)
        bb = min(tile, _round_up(pl.cdiv(B, 4), 256))
    grid = (pl.cdiv(B, bb),)

    def resident(x):
        # Constant index_map -> block stays resident across the batch grid (no re-DMA).
        return pl.BlockSpec(x.shape, lambda i: (0, 0))

    # VMEM budget (rough, with 2x headroom). Only raise the scoped limit if needed
    # (v7x: 64 MiB physical / 32 MiB scoped default).
    act_bytes = bb * (256 * 6 + 128 * 6 + 64 * 6 + 256)          # f32 + bf16 activations
    io_bytes = 2 * bb * (state_dim + action_dim) * 4 + 2 * bb * 4  # double-buffered in/out
    w_bytes = ((state_dim + action_dim) * 256 + 256 * 128 + 128 * 64) * 2 \
              + (256 + 128 + 64 + 64) * 4
    vmem_need = 2 * (act_bytes + io_bytes + w_bytes)
    compiler_params = pltpu.CompilerParams(
        dimension_semantics=("parallel",),
        vmem_limit_bytes=int(vmem_need) if vmem_need > (32 << 20) else None,
    )

    flops = 2 * B * ((state_dim + action_dim) * 256 + 256 * 128 + 128 * 64 + 64)
    bytes_accessed = (
        B * (state_dim + action_dim) * 4                                    # inputs (f32)
        + B * 4                                                             # output (f32)
        + ((state_dim + action_dim) * 256 + 256 * 128 + 128 * 64) * 2       # bf16 weights
        + (256 + 128 + 64 + 64 + 1) * 4)                                    # f32 biases + w4

    out_t = pl.pallas_call(
        critic_kernel,
        out_shape=jax.ShapeDtypeStruct((1, B), jnp.float32),
        grid_spec=pltpu.PrefetchScalarGridSpec(
            num_scalar_prefetch=0,
            grid=grid,
            in_specs=[
                pl.BlockSpec((state_dim, bb), lambda i: (0, i)),    # state^T tile
                pl.BlockSpec((action_dim, bb), lambda i: (0, i)),   # action^T tile
                resident(w1ts), resident(w1ta), resident(b1c),
                resident(w2t), resident(b2c),
                resident(w3t), resident(b3c),
                resident(w4c),
                pl.BlockSpec(memory_space=pltpu.MemorySpace.SMEM),  # b4 scalar
            ],
            out_specs=pl.BlockSpec((1, bb), lambda i: (0, i)),      # lane-dense output
        ),
        compiler_params=compiler_params,
        cost_estimate=pl.CostEstimate(
            flops=flops, transcendentals=0, bytes_accessed=bytes_accessed),
    )(state_t, action_t, w1ts, w1ta, b1c, w2t, b2c, w3t, b3c, w4c, b4s)

    # [1, B] -> [B, 1]: pure layout reshape, no data movement cost worth noting.
    return out_t.reshape(B, 1)


def init_critic_params(key, state_dim, action_dim):
    """Deterministic init mimicking PyTorch nn.Linear default (U[-1/sqrt(fan_in), +])."""
    dims = [state_dim + action_dim, 256, 128, 64, 1]
    params = []
    for i in range(4):
        fan_in, fan_out = dims[i], dims[i + 1]
        key, kw, kb = jax.random.split(key, 3)
        bound = 1.0 / jnp.sqrt(fan_in)
        w = jax.random.uniform(kw, (fan_in, fan_out), jnp.float32, -bound, bound)
        b = jax.random.uniform(kb, (1, fan_out), jnp.float32, -bound, bound)
        params += [w, b]
    return tuple(params)


def critic_reference(state, action, params):
    """Pure-JAX f32 reference for correctness check (Dropout = identity in eval)."""
    x = jnp.concatenate([state, action], axis=1)
    w1, b1, w2, b2, w3, b3, w4, b4 = params
    h = jnp.maximum(x @ w1 + b1, 0.0)
    h = jnp.maximum(h @ w2 + b2, 0.0)
    h = jnp.maximum(h @ w3 + b3, 0.0)
    return h @ w4 + b4


if __name__ == "__main__":
    key = jax.random.PRNGKey(0)
    k_state, k_action, k_params, k_state2, k_action2 = jax.random.split(key, 5)

    state_dim, action_dim = 16, 8
    params = init_critic_params(k_params, state_dim, action_dim)
    prep = prepare_critic_params(params, state_dim)   # one-time, hoisted param prep

    # Small single-tile case (full-dim batch block).
    batch = 8
    state = jax.random.normal(k_state, (batch, state_dim), jnp.float32)
    action = jax.random.normal(k_action, (batch, action_dim), jnp.float32)
    out = jax.block_until_ready(critic_forward(state, action, prep))
    ref = critic_reference(state, action, params)
    assert out.shape == (batch, 1), out.shape
    # bf16 matmul operands / activations with f32 accumulation: loosened vs f32 ref.
    assert jnp.allclose(out, ref, atol=2e-2, rtol=2e-2), (out, ref)

    # Multi-tile grid (2 x 256 batch tiles; exercises pipelining / v7x dual-TC sharding).
    batch2 = 512
    state2 = jax.random.normal(k_state2, (batch2, state_dim), jnp.float32)
    action2 = jax.random.normal(k_action2, (batch2, action_dim), jnp.float32)
    out2 = jax.block_until_ready(critic_forward(state2, action2, prep, block_b=256))
    ref2 = critic_reference(state2, action2, params)
    assert out2.shape == (batch2, 1), out2.shape
    assert jnp.allclose(out2, ref2, atol=2e-2, rtol=2e-2), (out2, ref2)

    print("KERNEL_OK")
</pallas_src>

<mosaic_0001>
module attributes {stable_mosaic.version = 11 : i64} {
  func.func @critic_kernel(%arg0: i32, %arg1: memref<16x8xf32, #tpu.memory_space<vmem>>, %arg2: memref<8x8xf32, #tpu.memory_space<vmem>>, %arg3: memref<256x16xbf16, #tpu.memory_space<vmem>>, %arg4: memref<256x8xbf16, #tpu.memory_space<vmem>>, %arg5: memref<256x1xf32, #tpu.memory_space<vmem>>, %arg6: memref<128x256xbf16, #tpu.memory_space<vmem>>, %arg7: memref<128x1xf32, #tpu.memory_space<vmem>>, %arg8: memref<64x128xbf16, #tpu.memory_space<vmem>>, %arg9: memref<64x1xf32, #tpu.memory_space<vmem>>, %arg10: memref<64x1xf32, #tpu.memory_space<vmem>>, %arg11: memref<1x1xf32, #tpu.memory_space<smem>>, %arg12: memref<1x8xf32, #tpu.memory_space<vmem>>) attributes {dimension_semantics = [#tpu.dimension_semantics<parallel>], iteration_bounds = array<i64: 1>, scalar_prefetch = 0 : i64, scratch_operands = 0 : i64, tpu.core_type = #tpu.core_type<tc>, window_params = [{transform_indices = @transform_0, window_bounds = array<i64: 16, 8>}, {transform_indices = @transform_1, window_bounds = array<i64: 8, 8>}, {pipeline_mode = #tpu.pipeline_mode<synchronous>, transform_indices = @transform_2, window_bounds = array<i64: 256, 16>}, {pipeline_mode = #tpu.pipeline_mode<synchronous>, transform_indices = @transform_3, window_bounds = array<i64: 256, 8>}, {pipeline_mode = #tpu.pipeline_mode<synchronous>, transform_indices = @transform_4, window_bounds = array<i64: 256, 1>}, {pipeline_mode = #tpu.pipeline_mode<synchronous>, transform_indices = @transform_5, window_bounds = array<i64: 128, 256>}, {pipeline_mode = #tpu.pipeline_mode<synchronous>, transform_indices = @transform_6, window_bounds = array<i64: 128, 1>}, {pipeline_mode = #tpu.pipeline_mode<synchronous>, transform_indices = @transform_7, window_bounds = array<i64: 64, 128>}, {pipeline_mode = #tpu.pipeline_mode<synchronous>, transform_indices = @transform_8, window_bounds = array<i64: 64, 1>}, {pipeline_mode = #tpu.pipeline_mode<synchronous>, transform_indices = @transform_9, window_bounds = array<i64: 64, 1>}, {transform_indices = @transform_10, window_bounds = array<i64: 1, 1>}, {transform_indices = @transform_11, window_bounds = array<i64: 1, 8>}]} {
    %c0 = arith.constant 0 : index
    %c0_0 = arith.constant 0 : index
    %0 = vector.load %arg1[%c0, %c0_0] : memref<16x8xf32, #tpu.memory_space<vmem>>, vector<16x8xf32>
    %1 = arith.truncf %0 : vector<16x8xf32> to vector<16x8xbf16>
    %c0_1 = arith.constant 0 : index
    %c0_2 = arith.constant 0 : index
    %2 = vector.load %arg2[%c0_1, %c0_2] : memref<8x8xf32, #tpu.memory_space<vmem>>, vector<8x8xf32>
    %3 = arith.truncf %2 : vector<8x8xf32> to vector<8x8xbf16>
    %c0_3 = arith.constant 0 : index
    %c0_4 = arith.constant 0 : index
    %4 = vector.load %arg3[%c0_3, %c0_4] : memref<256x16xbf16, #tpu.memory_space<vmem>>, vector<256x16xbf16>
    %cst = arith.constant dense<0.000000e+00> : vector<256x8xf32>
    %5 = tpu.matmul %4, %1, %cst {dimension_numbers = #tpu.dot_dimension_numbers<[1], [0], [0], [1], [0, 0, 1, 1], [], []>} : vector<256x16xbf16>, vector<16x8xbf16>, vector<256x8xf32> -> vector<256x8xf32>
    %c0_5 = arith.constant 0 : index
    %c0_6 = arith.constant 0 : index
    %6 = vector.load %arg4[%c0_5, %c0_6] : memref<256x8xbf16, #tpu.memory_space<vmem>>, vector<256x8xbf16>
    %cst_7 = arith.constant dense<0.000000e+00> : vector<256x8xf32>
    %7 = tpu.matmul %6, %3, %cst_7 {dimension_numbers = #tpu.dot_dimension_numbers<[1], [0], [0], [1], [0, 0, 1, 1], [], []>} : vector<256x8xbf16>, vector<8x8xbf16>, vector<256x8xf32> -> vector<256x8xf32>
    %8 = arith.addf %5, %7 : vector<256x8xf32>
    %c0_8 = arith.constant 0 : index
    %c0_9 = arith.constant 0 : index
    %9 = vector.load %arg5[%c0_8, %c0_9] : memref<256x1xf32, #tpu.memory_space<vmem>>, vector<256x1xf32>
    %10 = vector.broadcast %9 : vector<256x1xf32> to vector<256x8xf32>
    %11 = arith.addf %8, %10 : vector<256x8xf32>
    %cst_10 = arith.constant 0.000000e+00 : f32
    %12 = vector.broadcast %cst_10 : f32 to vector<256x8xf32>
    %13 = arith.maximumf %11, %12 : vector<256x8xf32>
    %14 = arith.truncf %13 : vector<256x8xf32> to vector<256x8xbf16>
    %c0_11 = arith.constant 0 : index
    %c0_12 = arith.constant 0 : index
    %15 = vector.load %arg6[%c0_11, %c0_12] : memref<128x256xbf16, #tpu.memory_space<vmem>>, vector<128x256xbf16>
    %cst_13 = arith.constant dense<0.000000e+00> : vector<128x8xf32>
    %16 = tpu.matmul %15, %14, %cst_13 {dimension_numbers = #tpu.dot_dimension_numbers<[1], [0], [0], [1], [0, 0, 1, 1], [], []>} : vector<128x256xbf16>, vector<256x8xbf16>, vector<128x8xf32> -> vector<128x8xf32>
    %c0_14 = arith.constant 0 : index
    %c0_15 = arith.constant 0 : index
    %17 = vector.load %arg7[%c0_14, %c0_15] : memref<128x1xf32, #tpu.memory_space<vmem>>, vector<128x1xf32>
    %18 = vector.broadcast %17 : vector<128x1xf32> to vector<128x8xf32>
    %19 = arith.addf %16, %18 : vector<128x8xf32>
    %cst_16 = arith.constant 0.000000e+00 : f32
    %20 = vector.broadcast %cst_16 : f32 to vector<128x8xf32>
    %21 = arith.maximumf %19, %20 : vector<128x8xf32>
    %22 = arith.truncf %21 : vector<128x8xf32> to vector<128x8xbf16>
    %c0_17 = arith.constant 0 : index
    %c0_18 = arith.constant 0 : index
    %23 = vector.load %arg8[%c0_17, %c0_18] : memref<64x128xbf16, #tpu.memory_space<vmem>>, vector<64x128xbf16>
    %cst_19 = arith.constant dense<0.000000e+00> : vector<64x8xf32>
    %24 = tpu.matmul %23, %22, %cst_19 {dimension_numbers = #tpu.dot_dimension_numbers<[1], [0], [0], [1], [0, 0, 1, 1], [], []>} : vector<64x128xbf16>, vector<128x8xbf16>, vector<64x8xf32> -> vector<64x8xf32>
    %c0_20 = arith.constant 0 : index
    %c0_21 = arith.constant 0 : index
    %25 = vector.load %arg9[%c0_20, %c0_21] : memref<64x1xf32, #tpu.memory_space<vmem>>, vector<64x1xf32>
    %26 = vector.broadcast %25 : vector<64x1xf32> to vector<64x8xf32>
    %27 = arith.addf %24, %26 : vector<64x8xf32>
    %cst_22 = arith.constant 0.000000e+00 : f32
    %28 = vector.broadcast %cst_22 : f32 to vector<64x8xf32>
    %29 = arith.maximumf %27, %28 : vector<64x8xf32>
    %c0_23 = arith.constant 0 : index
    %c0_24 = arith.constant 0 : index
    %30 = vector.load %arg10[%c0_23, %c0_24] : memref<64x1xf32, #tpu.memory_space<vmem>>, vector<64x1xf32>
    %31 = vector.broadcast %30 : vector<64x1xf32> to vector<64x8xf32>
    %32 = arith.mulf %29, %31 : vector<64x8xf32>
    %cst_25 = arith.constant dense<0.000000e+00> : vector<8xf32>
    %33 = vector.multi_reduction <add>, %32, %cst_25 [0] : vector<64x8xf32> to vector<8xf32>
    %34 = vector.shape_cast %33 : vector<8xf32> to vector<1x8xf32>
    %c0_26 = arith.constant 0 : index
    %c0_27 = arith.constant 0 : index
    %35 = memref.load %arg11[%c0_26, %c0_27] : memref<1x1xf32, #tpu.memory_space<smem>>
    %36 = vector.broadcast %35 : f32 to vector<1x8xf32>
    %37 = arith.addf %34, %36 : vector<1x8xf32>
    %c0_28 = arith.constant 0 : index
    %c0_29 = arith.constant 0 : index
    %38 = vector.load %arg12[%c0_28, %c0_29] : memref<1x8xf32, #tpu.memory_space<vmem>>, vector<1x8xf32>
    tpu.vector_store %arg12[%c0_28, %c0_29], %37 {strides = array<i32>} : memref<1x8xf32, #tpu.memory_space<vmem>>, vector<1x8xf32>,
    return
  }
  func.func @transform_0(%arg0: i32) -> (i32, i32) {
    %c0_i32 = arith.constant 0 : i32
    %c0_i32_0 = arith.constant 0 : i32
    return %c0_i32, %arg0 : i32, i32
  }
  func.func @transform_1(%arg0: i32) -> (i32, i32) {
    %c0_i32 = arith.constant 0 : i32
    %c0_i32_0 = arith.constant 0 : i32
    return %c0_i32, %arg0 : i32, i32
  }
  func.func @transform_2(%arg0: i32) -> (i32, i32) {
    %c0_i32 = arith.constant 0 : i32
    %c0_i32_0 = arith.constant 0 : i32
    %c0_i32_1 = arith.constant 0 : i32
    return %c0_i32, %c0_i32_0 : i32, i32
  }
  func.func @transform_3(%arg0: i32) -> (i32, i32) {
    %c0_i32 = arith.constant 0 : i32
    %c0_i32_0 = arith.constant 0 : i32
    %c0_i32_1 = arith.constant 0 : i32
    return %c0_i32, %c0_i32_0 : i32, i32
  }
  func.func @transform_4(%arg0: i32) -> (i32, i32) {
    %c0_i32 = arith.constant 0 : i32
    %c0_i32_0 = arith.constant 0 : i32
    %c0_i32_1 = arith.constant 0 : i32
    return %c0_i32, %c0_i32_0 : i32, i32
  }
  func.func @transform_5(%arg0: i32) -> (i32, i32) {
    %c0_i32 = arith.constant 0 : i32
    %c0_i32_0 = arith.constant 0 : i32
    %c0_i32_1 = arith.constant 0 : i32
    return %c0_i32, %c0_i32_0 : i32, i32
  }
  func.func @transform_6(%arg0: i32) -> (i32, i32) {
    %c0_i32 = arith.constant 0 : i32
    %c0_i32_0 = arith.constant 0 : i32
    %c0_i32_1 = arith.constant 0 : i32
    return %c0_i32, %c0_i32_0 : i32, i32
  }
  func.func @transform_7(%arg0: i32) -> (i32, i32) {
    %c0_i32 = arith.constant 0 : i32
    %c0_i32_0 = arith.constant 0 : i32
    %c0_i32_1 = arith.constant 0 : i32
    return %c0_i32, %c0_i32_0 : i32, i32
  }
  func.func @transform_8(%arg0: i32) -> (i32, i32) {
    %c0_i32 = arith.constant 0 : i32
    %c0_i32_0 = arith.constant 0 : i32
    %c0_i32_1 = arith.constant 0 : i32
    return %c0_i32, %c0_i32_0 : i32, i32
  }
  func.func @transform_9(%arg0: i32) -> (i32, i32) {
    %c0_i32 = arith.constant 0 : i32
    %c0_i32_0 = arith.constant 0 : i32
    %c0_i32_1 = arith.constant 0 : i32
    return %c0_i32, %c0_i32_0 : i32, i32
  }
  func.func @transform_10(%arg0: i32) -> (i32, i32) {
    %c0_i32 = arith.constant 0 : i32
    %c0_i32_0 = arith.constant 0 : i32
    %c0_i32_1 = arith.constant 0 : i32
    return %c0_i32, %c0_i32_0 : i32, i32
  }
  func.func @transform_11(%arg0: i32) -> (i32, i32) {
    %c0_i32 = arith.constant 0 : i32
    %c0_i32_0 = arith.constant 0 : i32
    return %c0_i32, %arg0 : i32, i32
  }
}

</mosaic_0001>

<bundles_post_ra>
// kernel: critic_forward.1
= control target key start
LH: loop header
LB: loop body
LE: loop exit
PB: predicated region body
PF: predicated region fallthrough
CT: control target
= control target key end

     0   :  { %vm239_vm0 = vcmask 1043456   ;;  %vm190_vm1 = vcmask 64512   ;;  %v1935_v9 = vmov 0   ;;  %vm484_vm2 = vcmask 130048   ;;  %s2481_s0 = inlined_call_operand.vmem [shape: f32[16,8], index: 0, kind: input, shape index: {}]   ;;  %s2482_s1 = inlined_call_operand.vmem [shape: f32[8,8], index: 1, kind: input, shape index: {}]   ;;  %s2483_s2 = inlined_call_operand.vmem [shape: bf16[256,16], index: 2, kind: input, shape index: {}]   ;;  %s2484_s3 = inlined_call_operand.vmem [shape: bf16[256,8], index: 3, kind: input, shape index: {}]   ;;  %s2485_s4 = inlined_call_operand.vmem [shape: f32[256,1], index: 4, kind: input, shape index: {}]   ;;  %s2486_s5 = inlined_call_operand.vmem [shape: bf16[128,256], index: 5, kind: input, shape index: {}]   ;;  %s2487_s6 = inlined_call_operand.vmem [shape: f32[128,1], index: 6, kind: input, shape index: {}]   ;;  %s2488_s7 = inlined_call_operand.vmem [shape: bf16[64,128], index: 7, kind: input, shape index: {}]   ;;  %s2489_s8 = inlined_call_operand.vmem [shape: f32[64,1], index: 8, kind: input, shape index: {}]   ;;  %s2490_s9 = inlined_call_operand.vmem [shape: f32[64,1], index: 9, kind: input, shape index: {}]   ;;  %s2491_s10 = inlined_call_operand.<no memory space> [shape: f32[1,1], index: 10, kind: input, shape index: {}]   ;;  %s2492_s11 = inlined_call_operand.hbm [shape: f32[1,8], index: 11, kind: output, shape index: {}]  }
   0x1   :  { %v44_v0 = vld [vmem:[%s2482_s1] sm:$0xff]  ;;  %v42_v4 = vld [vmem:[%s2481_s0 + $0x8] sm:$0xff]  ;;  %v1853_v8 = vld [vmem:[%s2484_s3 + $0x10] sm:$0xff]   ;;  %1850 = vset.pattern.permute.xlu1 %v1935_v9  ;;  %1849 = vset.pattern.permute.xlu0 %v1935_v9 }
   0x2   :  { %v45_v1 = vpack.c.bf16 %v44_v0, %v44_v0  ;;  %v1851_v2 = vld [vmem:[%s2484_s3] sm:$0xff]   ;;  %v1852_v6 = vld [vmem:[%s2484_s3 + $0x8] sm:$0xff]   ;;  %v1854_v12 = vld [vmem:[%s2484_s3 + $0x18] sm:$0xff]  }
   0x3   :  { %v41_v3 = vld [vmem:[%s2481_s0] sm:$0xff]  ;;  %1724 = vmatprep.mubr.msk.bf16.mxu0 %vm190_vm1, %v1851_v2  ;;  %v711_v13 = vld [vmem:[%s2485_s4 + $0x88] sm:$0xff]  ;;  %v712_v16 = vld [vmem:[%s2485_s4 + $0x90] sm:$0xff] }
   0x4   :  { %1846 = vmatprep.subr.msk.bf16.mxu0 %vm239_vm0, %v45_v1  ;;  %v241_v5 = vsel %vm239_vm0, %v45_v1, 0  ;;  %v43_v7 = vpack.c.bf16 %v42_v4, %v41_v3  ;;  %v710_v10 = vld [vmem:[%s2485_s4 + $0x80] sm:$0xff]  ;;  %v695_v14 = vld [vmem:[%s2485_s4 + $0x8] sm:$0xff]  ;;  %v713_v17 = vld [vmem:[%s2485_s4 + $0x98] sm:$0xff] }
   0x5   :  { %1723 = vmatpush3.bf16.msra.mxu0 %v241_v5  ;;  %v694_v11 = vld [vmem:[%s2485_s4] sm:$0xff]  ;;  %808 = vperm.xlu0 %1849, %v710_v10   ;;  %v1856_v18 = vld [vmem:[%s2484_s3 + $0x28] sm:$0xff]   ;;  %v696_v19 = vld [vmem:[%s2485_s4 + $0x10] sm:$0xff] }
   0x6   :  { %1756 = vmatprep.subr.bf16.mxu0 %v43_v7  ;;  %728 = vperm.xlu1 %1850, %v694_v11   ;;  %v1855_v15 = vld [vmem:[%s2484_s3 + $0x20] sm:$0xff]   ;;  %v697_v20 = vld [vmem:[%s2485_s4 + $0x18] sm:$0xff]  ;;  %v1857_v21 = vld [vmem:[%s2484_s3 + $0x30] sm:$0xff]  }
   0x7   :  { %v714_v22 = vld [vmem:[%s2485_s4 + $0xa0] sm:$0xff]  ;;  %v715_v23 = vld [vmem:[%s2485_s4 + $0xa8] sm:$0xff]  ;;  %v1858_v24 = vld [vmem:[%s2484_s3 + $0x38] sm:$0xff]  }
   0x8   :  { %1725 = vmatmul.mubr.msk.bf16.vlgmr.msra.gmra.mrb[0].mxu0 %vm190_vm1, %v1852_v6  ;;  %v698_v25 = vld [vmem:[%s2485_s4 + $0x20] sm:$0xff]  ;;  %v699_v26 = vld [vmem:[%s2485_s4 + $0x28] sm:$0xff]  ;;  %v716_v28 = vld [vmem:[%s2485_s4 + $0xb0] sm:$0xff] }
   0x9   :  { %1757 = vmatpush3.bf16.msra.mxu0 %v43_v7  ;;  %1728 = vmatprep.mubr.msk.bf16.mxu0 %vm190_vm1, %v1853_v8  ;;  %v1859_v27 = vld [vmem:[%s2484_s3 + $0x40] sm:$0xff]   ;;  %v717_v29 = vld [vmem:[%s2485_s4 + $0xb8] sm:$0xff]  ;;  %v1860_v30 = vld [vmem:[%s2484_s3 + $0x48] sm:$0xff]  }
   0xa   :  { %813 = vperm.xlu0 %1849, %v711_v13   ;;  %733 = vperm.xlu1 %1850, %v695_v14   ;;  %v700_v31 = vld [vmem:[%s2485_s4 + $0x30] sm:$0xff]  ;;  %v701_v32 = vld [vmem:[%s2485_s4 + $0x38] sm:$0xff]  ;;  %v718_v34 = vld [vmem:[%s2485_s4 + $0xc0] sm:$0xff] }
   0xb   :  { %v1861_v33 = vld [vmem:[%s2484_s3 + $0x50] sm:$0xff]   ;;  %v719_v35 = vld [vmem:[%s2485_s4 + $0xc8] sm:$0xff]  ;;  %v1862_v36 = vld [vmem:[%s2484_s3 + $0x58] sm:$0xff]  }
   0xc   :  { %v702_v37 = vld [vmem:[%s2485_s4 + $0x40] sm:$0xff]  ;;  %v703_v38 = vld [vmem:[%s2485_s4 + $0x48] sm:$0xff]  ;;  %v720_v40 = vld [vmem:[%s2485_s4 + $0xd0] sm:$0xff] }
   0xd   :  { %v1863_v39 = vld [vmem:[%s2484_s3 + $0x60] sm:$0xff]   ;;  %v721_v41 = vld [vmem:[%s2485_s4 + $0xd8] sm:$0xff]  ;;  %v1864_v42 = vld [vmem:[%s2484_s3 + $0x68] sm:$0xff]  }
   0xe   :  { %818 = vperm.xlu0 %1849, %v712_v16   ;;  %823 = vperm.xlu1 %1850, %v713_v17   ;;  %v704_v43 = vld [vmem:[%s2485_s4 + $0x50] sm:$0xff]  ;;  %v705_v44 = vld [vmem:[%s2485_s4 + $0x58] sm:$0xff]  ;;  %v722_v46 = vld [vmem:[%s2485_s4 + $0xe0] sm:$0xff] }
   0xf   :  { %v1865_v45 = vld [vmem:[%s2484_s3 + $0x70] sm:$0xff]   ;;  %v723_v47 = vld [vmem:[%s2485_s4 + $0xe8] sm:$0xff]  ;;  %v1866_v48 = vld [vmem:[%s2484_s3 + $0x78] sm:$0xff]  }
  0x10   :  { %1729 = vmatmul.mubr.msk.bf16.gmra.mrb[4].mxu0 %vm190_vm1, %v1854_v12  ;;  %v706_v49 = vld [vmem:[%s2485_s4 + $0x60] sm:$0xff]  ;;  %v707_v50 = vld [vmem:[%s2485_s4 + $0x68] sm:$0xff] }
  0x11   :  { %1732 = vmatprep.mubr.msk.bf16.mxu0 %vm190_vm1, %v1855_v15  ;;  %v1867_v51 = vld [vmem:[%s2483_s2] sm:$0xff]  }
  0x12   :  { %738 = vperm.xlu0 %1849, %v696_v19   ;;  %743 = vperm.xlu1 %1850, %v697_v20  }
  0x16   :  { %828 = vperm.xlu0 %1849, %v714_v22   ;;  %833 = vperm.xlu1 %1850, %v715_v23  }
  0x18   :  { %1733 = vmatmul.mubr.msk.bf16.gmra.mrb[8].mxu0 %vm190_vm1, %v1856_v18 }
  0x19   :  { %1736 = vmatprep.mubr.msk.bf16.mxu0 %vm190_vm1, %v1857_v21 }
  0x1a   :  { %748 = vperm.xlu0 %1849, %v698_v25   ;;  %753 = vperm.xlu1 %1850, %v699_v26  }
  0x1e   :  { %838 = vperm.xlu0 %1849, %v716_v28   ;;  %843 = vperm.xlu1 %1850, %v717_v29  }
  0x20   :  { %1737 = vmatmul.mubr.msk.bf16.gmra.mrb[12].mxu0 %vm190_vm1, %v1858_v24 }
  0x21   :  { %1740 = vmatprep.mubr.msk.bf16.mxu0 %vm190_vm1, %v1859_v27 }
  0x22   :  { %758 = vperm.xlu0 %1849, %v700_v31   ;;  %763 = vperm.xlu1 %1850, %v701_v32  }
  0x26   :  { %848 = vperm.xlu0 %1849, %v718_v34   ;;  %853 = vperm.xlu1 %1850, %v719_v35  }
  0x28   :  { %1741 = vmatmul.mubr.msk.bf16.gmra.mrb[16].mxu0 %vm190_vm1, %v1860_v30 }
  0x29   :  { %1744 = vmatprep.mubr.msk.bf16.mxu0 %vm190_vm1, %v1861_v33 }
  0x2a   :  { %768 = vperm.xlu0 %1849, %v702_v37   ;;  %773 = vperm.xlu1 %1850, %v703_v38  }
  0x2e   :  { %858 = vperm.xlu0 %1849, %v720_v40   ;;  %863 = vperm.xlu1 %1850, %v721_v41  }
  0x30   :  { %1745 = vmatmul.mubr.msk.bf16.gmra.mrb[20].mxu0 %vm190_vm1, %v1862_v36 }
  0x31   :  { %1748 = vmatprep.mubr.msk.bf16.mxu0 %vm190_vm1, %v1863_v39 }
  0x32   :  { %778 = vperm.xlu0 %1849, %v704_v43   ;;  %783 = vperm.xlu1 %1850, %v705_v44  }
  0x36   :  { %868 = vperm.xlu0 %1849, %v722_v46   ;;  %873 = vperm.xlu1 %1850, %v723_v47  }
  0x38   :  { %1749 = vmatmul.mubr.msk.bf16.gmra.mrb[24].mxu0 %vm190_vm1, %v1864_v42 }
  0x39   :  { %1752 = vmatprep.mubr.msk.bf16.mxu0 %vm190_vm1, %v1865_v45 }
  0x3a   :  { %788 = vperm.xlu0 %1849, %v706_v49   ;;  %793 = vperm.xlu1 %1850, %v707_v50  }
  0x3b   :  { %17 = vsyncpa [#allocation4], 0  ;;  %v724_v52 = vld [vmem:[%s2485_s4 + $0xf0] sm:$0xff]  ;;  %v725_v53 = vld [vmem:[%s2485_s4 + $0xf8] sm:$0xff]  ;;  %vm1512_vm3 = vcmask 57344  }
  0x3c   :  { %v1868_v54 = vld [vmem:[%s2483_s2 + $0x8] sm:$0xff]   ;;  %v708_v55 = vld [vmem:[%s2485_s4 + $0x70] sm:$0xff]  ;;  %v709_v56 = vld [vmem:[%s2485_s4 + $0x78] sm:$0xff] }
  0x3d   :  { %v1869_v57 = vld [vmem:[%s2483_s2 + $0x10] sm:$0xff]   ;;  %v982_v58 = vld [vmem:[%s2487_s6] sm:$0xff]  ;;  %v983_v59 = vld [vmem:[%s2487_s6 + $0x8] sm:$0xff] }
  0x3e   :  { %878 = vperm.xlu0 %1849, %v724_v52   ;;  %883 = vperm.xlu1 %1850, %v725_v53   ;;  %v1870_v60 = vld [vmem:[%s2483_s2 + $0x18] sm:$0xff]   ;;  %v984_v61 = vld [vmem:[%s2487_s6 + $0x10] sm:$0xff]  ;;  %v1871_v63 = vld [vmem:[%s2483_s2 + $0x20] sm:$0xff]  }
  0x3f   :  { %v985_v62 = vld [vmem:[%s2487_s6 + $0x18] sm:$0xff]  ;;  %v986_v0 = vld [vmem:[%s2487_s6 + $0x20] sm:$0xff]  ;;  %v987_v1 = vld [vmem:[%s2487_s6 + $0x28] sm:$0xff] }
  0x40   :  { %1753 = vmatmul.mubr.msk.bf16.gmra.mrb[28].mxu0 %vm190_vm1, %v1866_v48  ;;  %v1872_v2 = vld [vmem:[%s2483_s2 + $0x28] sm:$0xff]   ;;  %v988_v3 = vld [vmem:[%s2487_s6 + $0x30] sm:$0xff]  ;;  %v989_v4 = vld [vmem:[%s2487_s6 + $0x38] sm:$0xff] }
  0x41   :  { %1758 = vmatprep.mubr.msk.bf16.mxu0 %vm484_vm2, %v1867_v51  ;;  %v1873_v5 = vld [vmem:[%s2483_s2 + $0x30] sm:$0xff]   ;;  %v990_v6 = vld [vmem:[%s2487_s6 + $0x40] sm:$0xff]  ;;  %v991_v7 = vld [vmem:[%s2487_s6 + $0x48] sm:$0xff] }
  0x42   :  { %798 = vperm.xlu0 %1849, %v708_v55   ;;  %803 = vperm.xlu1 %1850, %v709_v56   ;;  %v1874_v8 = vld [vmem:[%s2483_s2 + $0x38] sm:$0xff]   ;;  %v992_v9 = vld [vmem:[%s2487_s6 + $0x50] sm:$0xff]  ;;  %v1875_v11 = vld [vmem:[%s2483_s2 + $0x40] sm:$0xff]  }
  0x43   :  { %v993_v10 = vld [vmem:[%s2487_s6 + $0x58] sm:$0xff]  ;;  %v994_v12 = vld [vmem:[%s2487_s6 + $0x60] sm:$0xff]  ;;  %v995_v13 = vld [vmem:[%s2487_s6 + $0x68] sm:$0xff] }
  0x44   :  { %v1876_v14 = vld [vmem:[%s2483_s2 + $0x48] sm:$0xff]   ;;  %v996_v15 = vld [vmem:[%s2487_s6 + $0x70] sm:$0xff]  ;;  %v997_v16 = vld [vmem:[%s2487_s6 + $0x78] sm:$0xff]  ;;  %s1936_s6 = smov [#allocation3]  }
  0x45   :  { %v1877_v17 = vld [vmem:[%s2483_s2 + $0x50] sm:$0xff]   ;;  %v1287_v18 = vld [vmem:[%s2489_s8] sm:$0xff]  ;;  %v1288_v19 = vld [vmem:[%s2489_s8 + $0x8] sm:$0xff]  ;;  %s1520_s24 = sshll.u32 %s1936_s6, 4  ;;  %s1521_s24 = int_to_ptr.vmem [resolvable:$true] %s1520_s24 }
  0x46   :  { %1000 = vperm.xlu0 %1849, %v982_v58   ;;  %1005 = vperm.xlu1 %1850, %v983_v59   ;;  %v1878_v20 = vld [vmem:[%s2483_s2 + $0x58] sm:$0xff]   ;;  %v1289_v21 = vld [vmem:[%s2489_s8 + $0x10] sm:$0xff]  ;;  %v1879_v23 = vld [vmem:[%s2483_s2 + $0x60] sm:$0xff]   ;;  %s1911_s1 = scalar_lea.vmem %s1521_s24, 16  ;;  %s1915_s25 = scalar_lea.vmem %s1521_s24, 32 }
  0x47   :  { %v1290_v22 = vld [vmem:[%s2489_s8 + $0x18] sm:$0xff]  ;;  %v1432_v24 = vld [vmem:[%s2490_s9] sm:$0xff]  ;;  %v1433_v25 = vld [vmem:[%s2490_s9 + $0x8] sm:$0xff]  ;;  %p1912_p0 = scmp.ne.s32.totalorder %s1521_s24, %s1911_s1  ;;  %p1916_p1 = scmp.lt.s32.totalorder %s1521_s24, %s1521_s24 }
  0x48   :  { %1759 = vmatmul.mubr.msk.bf16.vlgmr.msra.gmra.mrb[0].mxu0 %vm484_vm2, %v1868_v54  ;;  %v1880_v26 = vld [vmem:[%s2483_s2 + $0x68] sm:$0xff]   ;;  %v1291_v27 = vld [vmem:[%s2489_s8 + $0x20] sm:$0xff]  ;;  %v1434_v28 = vld [vmem:[%s2490_s9 + $0x10] sm:$0xff]  ;;  %p1917_p2 = scmp.lt.s32.totalorder %s1915_s25, %s1911_s1 }
  0x49   :  { %1762 = vmatprep.mubr.msk.bf16.mxu0 %vm484_vm2, %v1869_v57  ;;  %v1881_v29 = vld [vmem:[%s2483_s2 + $0x70] sm:$0xff]   ;;  %v1292_v30 = vld [vmem:[%s2489_s8 + $0x28] sm:$0xff]  ;;  %v1435_v31 = vld [vmem:[%s2490_s9 + $0x18] sm:$0xff] }
  0x4a   :  { %1010 = vperm.xlu0 %1849, %v984_v61   ;;  %1015 = vperm.xlu1 %1850, %v985_v62   ;;  %v1882_v32 = vld [vmem:[%s2483_s2 + $0x78] sm:$0xff]   ;;  %v1293_v33 = vld [vmem:[%s2489_s8 + $0x30] sm:$0xff]  ;;  %v1436_v34 = vld [vmem:[%s2490_s9 + $0x20] sm:$0xff]  ;;  %p1918_p3 = por %p1917_p2, %p1916_p1 }
  0x4b   :  { %v1294_v35 = vld [vmem:[%s2489_s8 + $0x38] sm:$0xff]  ;;  %v1437_v36 = vld [vmem:[%s2490_s9 + $0x28] sm:$0xff]  ;;  %v1438_v37 = vld [vmem:[%s2490_s9 + $0x30] sm:$0xff] }
  0x4c   :  { %v1439_v38 = vld [vmem:[%s2490_s9 + $0x38] sm:$0xff]  ;;  %v1885_v43 = vld [vmem:[%s2486_s5 + $0x4] ss:$8 sps:$4 sm:$0xff]   ;;  %p1919_p4 = pnand %p1918_p3, %p1912_p0 }
  0x4d   :  { %1190 = vmatprep.mubr.bf16.mxu1 %v1885_v43 }
  0x4e   :  { %1020 = vperm.xlu0 %1849, %v986_v0   ;;  %1025 = vperm.xlu1 %1850, %v987_v1  }
  0x50   :  { %1763 = vmatmul.mubr.msk.bf16.gmra.mrb[4].mxu0 %vm484_vm2, %v1870_v60 }
  0x51   :  { %1766 = vmatprep.mubr.msk.bf16.mxu0 %vm484_vm2, %v1871_v63 }
  0x52   :  { %1030 = vperm.xlu0 %1849, %v988_v3   ;;  %1035 = vperm.xlu1 %1850, %v989_v4  }
  0x56   :  { %1040 = vperm.xlu0 %1849, %v990_v6   ;;  %1045 = vperm.xlu1 %1850, %v991_v7  }
  0x58   :  { %1767 = vmatmul.mubr.msk.bf16.gmra.mrb[8].mxu0 %vm484_vm2, %v1872_v2 }
  0x59   :  { %1770 = vmatprep.mubr.msk.bf16.mxu0 %vm484_vm2, %v1873_v5 }
  0x5a   :  { %1050 = vperm.xlu0 %1849, %v992_v9   ;;  %1055 = vperm.xlu1 %1850, %v993_v10  }
  0x5e   :  { %1060 = vperm.xlu0 %1849, %v994_v12   ;;  %1065 = vperm.xlu1 %1850, %v995_v13  }
  0x60   :  { %1771 = vmatmul.mubr.msk.bf16.gmra.mrb[12].mxu0 %vm484_vm2, %v1874_v8 }
  0x61   :  { %1774 = vmatprep.mubr.msk.bf16.mxu0 %vm484_vm2, %v1875_v11 }
  0x62   :  { %1070 = vperm.xlu0 %1849, %v996_v15   ;;  %1075 = vperm.xlu1 %1850, %v997_v16  }
  0x66   :  { %1297 = vperm.xlu0 %1849, %v1287_v18   ;;  %1302 = vperm.xlu1 %1850, %v1288_v19  }
  0x68   :  { %1775 = vmatmul.mubr.msk.bf16.gmra.mrb[16].mxu0 %vm484_vm2, %v1876_v14 }
  0x69   :  { %1778 = vmatprep.mubr.msk.bf16.mxu0 %vm484_vm2, %v1877_v17 }
  0x6a   :  { %1307 = vperm.xlu0 %1849, %v1289_v21   ;;  %1312 = vperm.xlu1 %1850, %v1290_v22  }
  0x6e   :  { %1442 = vperm.xlu0 %1849, %v1432_v24   ;;  %1447 = vperm.xlu1 %1850, %v1433_v25  }
  0x70   :  { %1779 = vmatmul.mubr.msk.bf16.gmra.mrb[20].mxu0 %vm484_vm2, %v1878_v20 }
  0x71   :  { %1782 = vmatprep.mubr.msk.bf16.mxu0 %vm484_vm2, %v1879_v23 }
  0x72   :  { %1317 = vperm.xlu0 %1849, %v1291_v27   ;;  %1452 = vperm.xlu1 %1850, %v1434_v28  }
  0x76   :  { %1322 = vperm.xlu0 %1849, %v1292_v30   ;;  %1457 = vperm.xlu1 %1850, %v1435_v31  }
  0x78   :  { %1783 = vmatmul.mubr.msk.bf16.gmra.mrb[24].mxu0 %vm484_vm2, %v1880_v26 }
  0x79   :  { %1786 = vmatprep.mubr.msk.bf16.mxu0 %vm484_vm2, %v1881_v29 }
  0x7a   :  { %1327 = vperm.xlu0 %1849, %v1293_v33   ;;  %1462 = vperm.xlu1 %1850, %v1436_v34  }
  0x7e   :  { %1332 = vperm.xlu0 %1849, %v1294_v35   ;;  %1467 = vperm.xlu1 %1850, %v1437_v36  }
  0x80   :  { %1787 = vmatmul.mubr.msk.bf16.gmra.mrb[28].mxu0 %vm484_vm2, %v1882_v32 }
  0x82   :  { %1472 = vperm.xlu0 %1849, %v1438_v37   ;;  %1477 = vperm.xlu1 %1850, %v1439_v38  }
  0x84   :  { %v2326_v39 = vpop.permute.xlu0 %808 }
  0x85   :  { %v729_v40 = vpop.permute.xlu1 %728 }
  0x89   :  { %v2328_v41 = vpop.permute.xlu0 %813  ;;  %v734_v42 = vpop.permute.xlu1 %733 }
  0x8d   :  { %v2333_v44 = vpop.permute.xlu0 %818  ;;  %v2335_v45 = vpop.permute.xlu1 %823 }
  0x91   :  { %v739_v46 = vpop.permute.xlu0 %738  ;;  %v744_v47 = vpop.permute.xlu1 %743 }
  0x95   :  { %v2337_v48 = vpop.permute.xlu0 %828  ;;  %v2339_v49 = vpop.permute.xlu1 %833 }
  0x99   :  { %v749_v50 = vpop.permute.xlu0 %748  ;;  %v754_v51 = vpop.permute.xlu1 %753 }
  0x9d   :  { %v2341_v52 = vpop.permute.xlu0 %838  ;;  %v2343_v53 = vpop.permute.xlu1 %843 }
  0xa1   :  { %v759_v54 = vpop.permute.xlu0 %758  ;;  %v764_v55 = vpop.permute.xlu1 %763 }
  0xa5   :  { %v2345_v56 = vpop.permute.xlu0 %848  ;;  %v2347_v57 = vpop.permute.xlu1 %853 }
  0xa9   :  { %v769_v58 = vpop.permute.xlu0 %768  ;;  %v774_v59 = vpop.permute.xlu1 %773 }
  0xad   :  { %v2349_v60 = vpop.permute.xlu0 %858  ;;  %v2351_v61 = vpop.permute.xlu1 %863 }
  0xb1   :  { %v779_v62 = vpop.permute.xlu0 %778  ;;  %v784_v2 = vpop.permute.xlu1 %783 }
  0xb5   :  { %v2353_v10 = vpop.permute.xlu0 %868  ;;  %v2357_v14 = vpop.permute.xlu1 %873 }
  0xb9   :  { %v789_v23 = vpop.permute.xlu0 %788  ;;  %v794_v27 = vpop.permute.xlu1 %793 }
  0xbd   :  { %v2365_v35 = vpop.permute.xlu0 %878 }
 0x11b   :  { %v1760_v63 = vpop.f32.mrb[0].mxu0 }
 0x11c   :  { %v888_v0 = vadd.f32 %v1760_v63, %v739_v46  ;;  %v567_v1 = vpop.f32.mrb[1].mxu0 }
 0x11d   :  { %v886_v3 = vadd.f32 %v729_v40, %v567_v1  ;;  %v1761_v4 = vpop.f32.mrb[2].mxu0 }
 0x11e   :  { %v889_v5 = vadd.f32 %v1761_v4, %v744_v47  ;;  %v570_v6 = vpop.f32.mrb[3].mxu0  ;;  %v920_v8 = vmax.f32 %v888_v0, 0.0 }
 0x11f   :  { %v887_v7 = vadd.f32 %v734_v42, %v570_v6  ;;  %v918_v11 = vmax.f32 %v886_v3, 0.0  ;;  %v2367_v42 = vpop.permute.xlu1 %883 }
 0x120   :  { %v921_v9 = vmax.f32 %v889_v5, 0.0 }
 0x121   :  { %v919_v12 = vmax.f32 %v887_v7, 0.0 }
 0x122   :  { %v2355_v13 = vpack.c.bf16 %v921_v9, %v920_v8 }
 0x123   :  { %v1764_v15 = vpop.f32.mrb[4].mxu0  ;;  %v2359_v16 = vpack.c.bf16 %v919_v12, %v918_v11  ;;  %v804_v3 = vpop.permute.xlu1 %803 }
 0x124   :  { %v892_v17 = vadd.f32 %v1764_v15, %v759_v54  ;;  %v583_v18 = vpop.f32.mrb[5].mxu0 }
 0x125   :  { %v890_v19 = vadd.f32 %v749_v50, %v583_v18  ;;  %v1765_v20 = vpop.f32.mrb[6].mxu0 }
 0x126   :  { %v893_v21 = vadd.f32 %v1765_v20, %v764_v55  ;;  %v586_v22 = vpop.f32.mrb[7].mxu0  ;;  %v924_v25 = vmax.f32 %v892_v17, 0.0  ;;  %v799_v55 = vpop.permute.xlu0 %798 }
 0x127   :  { %v891_v24 = vadd.f32 %v754_v51, %v586_v22  ;;  %v922_v28 = vmax.f32 %v890_v19, 0.0 }
 0x128   :  { %v925_v26 = vmax.f32 %v893_v21, 0.0 }
 0x129   :  { %v923_v29 = vmax.f32 %v891_v24, 0.0 }
 0x12a   :  { %v2361_v30 = vpack.c.bf16 %v925_v26, %v924_v25 }
 0x12b   :  { %v2363_v31 = vpack.c.bf16 %v923_v29, %v922_v28  ;;  %v1768_v32 = vpop.f32.mrb[8].mxu0 }
 0x12c   :  { %v896_v33 = vadd.f32 %v1768_v32, %v779_v62  ;;  %v599_v34 = vpop.f32.mrb[9].mxu0 }
 0x12d   :  { %v894_v36 = vadd.f32 %v769_v58, %v599_v34  ;;  %v1769_v37 = vpop.f32.mrb[10].mxu0 }
 0x12e   :  { %v897_v38 = vadd.f32 %v1769_v37, %v784_v2  ;;  %v602_v40 = vpop.f32.mrb[11].mxu0  ;;  %v928_v46 = vmax.f32 %v896_v33, 0.0 }
 0x12f   :  { %v895_v43 = vadd.f32 %v774_v59, %v602_v40  ;;  %v926_v50 = vmax.f32 %v894_v36, 0.0 }
 0x130   :  { %v929_v47 = vmax.f32 %v897_v38, 0.0 }
 0x131   :  { %v927_v51 = vmax.f32 %v895_v43, 0.0 }
 0x132   :  { %v2369_v54 = vpack.c.bf16 %v929_v47, %v928_v46 }
 0x133   :  { %v2371_v63 = vpack.c.bf16 %v927_v51, %v926_v50  ;;  %v1772_v62 = vpop.f32.mrb[12].mxu0 }
 0x134   :  { %v900_v0 = vadd.f32 %v1772_v62, %v799_v55  ;;  %v615_v1 = vpop.f32.mrb[13].mxu0 }
 0x135   :  { %v898_v58 = vadd.f32 %v789_v23, %v615_v1  ;;  %v1773_v4 = vpop.f32.mrb[14].mxu0 }
 0x136   :  { %v901_v2 = vadd.f32 %v1773_v4, %v804_v3  ;;  %v618_v5 = vpop.f32.mrb[15].mxu0  ;;  %v932_v7 = vmax.f32 %v900_v0, 0.0 }
 0x137   :  { %v899_v6 = vadd.f32 %v794_v27, %v618_v5  ;;  %v930_v8 = vmax.f32 %v898_v58, 0.0 }
 0x138   :  { %v933_v59 = vmax.f32 %v901_v2, 0.0 }
 0x139   :  { %v931_v9 = vmax.f32 %v899_v6, 0.0 }
 0x13a   :  { %v2373_v11 = vpack.c.bf16 %v933_v59, %v932_v7 }
 0x13b   :  { %v2375_v12 = vpack.c.bf16 %v931_v9, %v930_v8  ;;  %v1776_v15 = vpop.f32.mrb[16].mxu0  ;;  %v1892_v9 = vld [vmem:[%s2486_s5 + $0x34] ss:$8 sps:$4 sm:$0xff]  }
 0x13c   :  { %v904_v17 = vadd.f32 %v1776_v15, %v2333_v44  ;;  %v631_v18 = vpop.f32.mrb[17].mxu0  ;;  %v1897_v15 = vld [vmem:[%s2486_s5 + $0x40] ss:$8 sps:$4 sm:$0xff]  }
 0x13d   :  { %v902_v19 = vadd.f32 %v2326_v39, %v631_v18  ;;  %v1777_v20 = vpop.f32.mrb[18].mxu0  ;;  %v1900_v18 = vld [vmem:[%s2486_s5 + $0x50] ss:$8 sps:$4 sm:$0xff]  }
 0x13e   :  { %v905_v21 = vadd.f32 %v1777_v20, %v2335_v45  ;;  %v634_v22 = vpop.f32.mrb[19].mxu0  ;;  %v936_v24 = vmax.f32 %v904_v17, 0.0  ;;  %v1898_v17 = vld [vmem:[%s2486_s5 + $0x54] ss:$8 sps:$4 sm:$0xff]   ;;  %v1903_v20 = vld [vmem:[%s2486_s5 + $0x60] ss:$8 sps:$4 sm:$0xff]  }
 0x13f   :  { %v903_v23 = vadd.f32 %v2328_v41, %v634_v22  ;;  %v934_v26 = vmax.f32 %v902_v19, 0.0  ;;  %v1901_v19 = vld [vmem:[%s2486_s5 + $0x64] ss:$8 sps:$4 sm:$0xff]   ;;  %v1906_v22 = vld [vmem:[%s2486_s5 + $0x70] ss:$8 sps:$4 sm:$0xff]  }
 0x140   :  { %v937_v25 = vmax.f32 %v905_v21, 0.0  ;;  %v1904_v21 = vld [vmem:[%s2486_s5 + $0x74] ss:$8 sps:$4 sm:$0xff]  }
 0x141   :  { %v935_v27 = vmax.f32 %v903_v23, 0.0  ;;  %v1907_v23 = vld [vmem:[%s2488_s7] sm:$0xff]  }
 0x142   :  { %v959_v28 = vpack.c.bf16 %v937_v25, %v936_v24 }
 0x143   :  { %v1780_v29 = vpop.f32.mrb[20].mxu0  ;;  %v958_v32 = vpack.c.bf16 %v935_v27, %v934_v26 }
 0x144   :  { %v908_v33 = vadd.f32 %v1780_v29, %v2341_v52  ;;  %v647_v34 = vpop.f32.mrb[21].mxu0 }
 0x145   :  { %v906_v44 = vadd.f32 %v2337_v48, %v647_v34  ;;  %v1781_v36 = vpop.f32.mrb[22].mxu0  ;;  %1646 = vmatprep.subr.bf16.mxu1 %v958_v32  ;;  %v1006_v34 = vpop.permute.xlu1 %1005 }
 0x146   :  { %v909_v39 = vadd.f32 %v1781_v36, %v2343_v53  ;;  %v650_v45 = vpop.f32.mrb[23].mxu0  ;;  %1647 = vmatpush3.bf16.msra.mxu1 %v2359_v16  ;;  %v940_v37 = vmax.f32 %v908_v33, 0.0 }
 0x147   :  { %v907_v41 = vadd.f32 %v2339_v49, %v650_v45  ;;  %1648 = vmatprep.subr.bf16.mxu1 %v959_v28  ;;  %v938_v40 = vmax.f32 %v906_v44, 0.0  ;;  %v1001_v28 = vpop.permute.xlu0 %1000 }
 0x148   :  { %v941_v38 = vmax.f32 %v909_v39, 0.0 }
 0x149   :  { %v939_v43 = vmax.f32 %v907_v41, 0.0 }
 0x14a   :  { %v961_v46 = vpack.c.bf16 %v941_v38, %v940_v37  ;;  %1649 = vmatpush3.bf16.msra.mxu1 %v2355_v13 }
 0x14b   :  { %v960_v52 = vpack.c.bf16 %v939_v43, %v938_v40  ;;  %v1784_v47 = vpop.f32.mrb[24].mxu0  ;;  %v1011_v43 = vpop.permute.xlu0 %1010 }
 0x14c   :  { %v912_v48 = vadd.f32 %v1784_v47, %v2349_v60  ;;  %v663_v50 = vpop.f32.mrb[25].mxu0 }
 0x14d   :  { %v910_v53 = vadd.f32 %v2345_v56, %v663_v50  ;;  %v1785_v51 = vpop.f32.mrb[26].mxu0  ;;  %1650 = vmatprep.subr.bf16.mxu1 %v960_v52 }
 0x14e   :  { %v913_v16 = vadd.f32 %v1785_v51, %v2351_v61  ;;  %v666_v49 = vpop.f32.mrb[27].mxu0  ;;  %1651 = vmatpush3.bf16.msra.mxu1 %v2363_v31  ;;  %v944_v62 = vmax.f32 %v912_v48, 0.0  ;;  %v1016_v48 = vpop.permute.xlu1 %1015 }
 0x14f   :  { %v911_v55 = vadd.f32 %v2347_v57, %v666_v49  ;;  %1652 = vmatprep.subr.bf16.mxu1 %v961_v46  ;;  %v942_v13 = vmax.f32 %v910_v53, 0.0 }
 0x150   :  { %v945_v0 = vmax.f32 %v913_v16, 0.0 }
 0x151   :  { %v943_v1 = vmax.f32 %v911_v55, 0.0 }
 0x152   :  { %v963_v3 = vpack.c.bf16 %v945_v0, %v944_v62  ;;  %1653 = vmatpush3.bf16.msra.mxu1 %v2361_v30 }
 0x153   :  { %v962_v60 = vpack.c.bf16 %v943_v1, %v942_v13  ;;  %v1788_v58 = vpop.f32.mrb[28].mxu0  ;;  %v1021_v13 = vpop.permute.xlu0 %1020 }
 0x154   :  { %v916_v56 = vadd.f32 %v1788_v58, %v2365_v35  ;;  %v679_v4 = vpop.f32.mrb[29].mxu0  ;;  %v1026_v58 = vpop.permute.xlu1 %1025 }
 0x155   :  { %v914_v61 = vadd.f32 %v2353_v10, %v679_v4  ;;  %v1789_v2 = vpop.f32.mrb[30].mxu0  ;;  %1654 = vmatprep.subr.bf16.mxu1 %v962_v60  ;;  %v1883_v10 = vld [vmem:[%s2486_s5] ss:$8 sps:$4 sm:$0xff]  }
 0x156   :  { %v917_v31 = vadd.f32 %v1789_v2, %v2367_v42  ;;  %v682_v57 = vpop.f32.mrb[31].mxu0  ;;  %1655 = vmatpush3.bf16.msra.mxu1 %v2371_v63  ;;  %v948_v6 = vmax.f32 %v916_v56, 0.0  ;;  %v1888_v42 = vld [vmem:[%s2486_s5 + $0x10] ss:$8 sps:$4 sm:$0xff]   ;;  %v1891_v63 = vld [vmem:[%s2486_s5 + $0x20] ss:$8 sps:$4 sm:$0xff]  }
 0x157   :  { %v915_v5 = vadd.f32 %v2357_v14, %v682_v57  ;;  %1656 = vmatprep.subr.bf16.mxu1 %v963_v3  ;;  %v946_v30 = vmax.f32 %v914_v61, 0.0  ;;  %v1886_v14 = vld [vmem:[%s2486_s5 + $0x14] ss:$8 sps:$4 sm:$0xff]  }
 0x158   :  { %v949_v7 = vmax.f32 %v917_v31, 0.0 }
 0x159   :  { %v947_v59 = vmax.f32 %v915_v5, 0.0 }
 0x15a   :  { %v965_v8 = vpack.c.bf16 %v949_v7, %v948_v6  ;;  %1657 = vmatpush3.bf16.msra.mxu1 %v2369_v54  ;;  %v1889_v54 = vld [vmem:[%s2486_s5 + $0x24] ss:$8 sps:$4 sm:$0xff]   ;;  %v1031_v7 = vpop.permute.xlu0 %1030 }
 0x15b   :  { %v964_v35 = vpack.c.bf16 %v947_v59, %v946_v30 }
 0x15d   :  { %1658 = vmatprep.subr.bf16.mxu1 %v964_v35  ;;  %v1036_v35 = vpop.permute.xlu1 %1035 }
 0x15e   :  { %1659 = vmatpush3.bf16.msra.mxu1 %v2375_v12  ;;  %v1895_v12 = vld [vmem:[%s2486_s5 + $0x44] ss:$8 sps:$4 sm:$0xff]  }
 0x15f   :  { %1660 = vmatprep.subr.bf16.mxu1 %v965_v8 }
 0x162   :  { %1661 = vmatpush3.bf16.msra.mxu1 %v2373_v11  ;;  %v1894_v11 = vld [vmem:[%s2486_s5 + $0x30] ss:$8 sps:$4 sm:$0xff]  }
 0x165   :  { %1191 = vmatmul.mubr.bf16.vlgmr.msra.gmra.mrb[0].mxu1 %v1883_v10 }
 0x166   :  { %1198 = vmatprep.mubr.bf16.mxu1 %v1886_v14 }
 0x16d   :  { %1199 = vmatmul.mubr.bf16.gmra.mrb[4].mxu1 %v1888_v42 }
 0x16e   :  { %1206 = vmatprep.mubr.bf16.mxu1 %v1889_v54 }
 0x175   :  { %1207 = vmatmul.mubr.bf16.gmra.mrb[8].mxu1 %v1891_v63 }
 0x176   :  { %1214 = vmatprep.mubr.bf16.mxu1 %v1892_v9 }
 0x17d   :  { %1215 = vmatmul.mubr.bf16.gmra.mrb[12].mxu1 %v1894_v11 }
 0x17e   :  { %1222 = vmatprep.mubr.bf16.mxu1 %v1895_v12 }
 0x185   :  { %1223 = vmatmul.mubr.bf16.gmra.mrb[16].mxu1 %v1897_v15  ;;  %v1041_v15 = vpop.permute.xlu0 %1040 }
 0x186   :  { %1230 = vmatprep.mubr.bf16.mxu1 %v1898_v17 }
 0x18d   :  { %1231 = vmatmul.mubr.bf16.gmra.mrb[20].mxu1 %v1900_v18 }
 0x18e   :  { %1238 = vmatprep.mubr.bf16.mxu1 %v1901_v19 }
 0x195   :  { %1239 = vmatmul.mubr.bf16.gmra.mrb[24].mxu1 %v1903_v20  ;;  %v1046_v20 = vpop.permute.xlu1 %1045 }
 0x196   :  { %1246 = vmatprep.mubr.bf16.mxu1 %v1904_v21 }
 0x19d   :  { %1247 = vmatmul.mubr.bf16.gmra.mrb[28].mxu1 %v1906_v22 }
 0x19e   :  { %1806 = vmatprep.mubr.bf16.mxu1 %v1907_v23 }
 0x238   :  { %v1662_v24 = vpop.f32.mrb[0].mxu1 }
 0x239   :  { %v1663_v25 = vpop.f32.mrb[1].mxu1 }
 0x23a   :  { %v1664_v26 = vadd.f32 %v1663_v25, %v1662_v24  ;;  %v1665_v27 = vpop.f32.mrb[2].mxu1 }
 0x23b   :  { %v1666_v29 = vpop.f32.mrb[3].mxu1 }
 0x23c   :  { %v1193_v32 = vadd.f32 %v1664_v26, %v1001_v28  ;;  %v1667_v33 = vadd.f32 %v1666_v29, %v1665_v27  ;;  %v1051_v29 = vpop.permute.xlu0 %1050 }
 0x23e   :  { %v1196_v44 = vadd.f32 %v1667_v33, %v1006_v34  ;;  %v1255_v36 = vmax.f32 %v1193_v32, 0.0 }
 0x240   :  { %v1256_v39 = vmax.f32 %v1196_v44, 0.0  ;;  %v1668_v45 = vpop.f32.mrb[4].mxu1  ;;  %v1056_v44 = vpop.permute.xlu1 %1055 }
 0x241   :  { %v1669_v41 = vpop.f32.mrb[5].mxu1 }
 0x242   :  { %v1670_v37 = vadd.f32 %v1669_v41, %v1668_v45  ;;  %v1671_v38 = vpop.f32.mrb[6].mxu1  ;;  %v1271_v40 = vpack.c.bf16 %v1256_v39, %v1255_v36 }
 0x243   :  { %v1672_v46 = vpop.f32.mrb[7].mxu1 }
 0x244   :  { %v1201_v52 = vadd.f32 %v1670_v37, %v1011_v43  ;;  %v1673_v47 = vadd.f32 %v1672_v46, %v1671_v38  ;;  %1790 = vmatprep.subr.bf16.mxu1 %v1271_v40  ;;  %v1061_v46 = vpop.permute.xlu0 %1060 }
 0x245   :  { %1791 = vmatpush3.bf16.msra.mxu1 %v1271_v40 }
 0x246   :  { %v1204_v50 = vadd.f32 %v1673_v47, %v1016_v48  ;;  %v1257_v53 = vmax.f32 %v1201_v52, 0.0 }
 0x248   :  { %v1258_v51 = vmax.f32 %v1204_v50, 0.0  ;;  %v1674_v16 = vpop.f32.mrb[8].mxu1  ;;  %v1066_v50 = vpop.permute.xlu1 %1065 }
 0x249   :  { %v1675_v49 = vpop.f32.mrb[9].mxu1 }
 0x24a   :  { %v1676_v55 = vadd.f32 %v1675_v49, %v1674_v16  ;;  %v1677_v62 = vpop.f32.mrb[10].mxu1  ;;  %v1272_v0 = vpack.c.bf16 %v1258_v51, %v1257_v53 }
 0x24b   :  { %v1678_v1 = vpop.f32.mrb[11].mxu1 }
 0x24c   :  { %v1209_v3 = vadd.f32 %v1676_v55, %v1021_v13  ;;  %v1679_v60 = vadd.f32 %v1678_v1, %v1677_v62  ;;  %1792 = vmatprep.subr.bf16.mxu1 %v1272_v0  ;;  %v1071_v1 = vpop.permute.xlu0 %1070 }
 0x24d   :  { %1793 = vmatpush3.bf16.msra.mxu1 %v1272_v0 }
 0x24e   :  { %v1212_v56 = vadd.f32 %v1679_v60, %v1026_v58  ;;  %v1259_v4 = vmax.f32 %v1209_v3, 0.0 }
 0x250   :  { %v1260_v61 = vmax.f32 %v1212_v56, 0.0  ;;  %v1680_v2 = vpop.f32.mrb[12].mxu1  ;;  %v1076_v56 = vpop.permute.xlu1 %1075 }
 0x251   :  { %v1681_v31 = vpop.f32.mrb[13].mxu1 }
 0x252   :  { %v1682_v57 = vadd.f32 %v1681_v31, %v1680_v2  ;;  %v1683_v5 = vpop.f32.mrb[14].mxu1  ;;  %v1273_v6 = vpack.c.bf16 %v1260_v61, %v1259_v4 }
 0x253   :  { %v1684_v30 = vpop.f32.mrb[15].mxu1 }
 0x254   :  { %v1217_v59 = vadd.f32 %v1682_v57, %v1031_v7  ;;  %v1685_v8 = vadd.f32 %v1684_v30, %v1683_v5  ;;  %1794 = vmatprep.subr.bf16.mxu1 %v1273_v6  ;;  %v1908_v57 = vld [vmem:[%s2488_s7 + $0x8] sm:$0xff]   ;;  %v1909_v5 = vld [vmem:[%s2488_s7 + $0x10] sm:$0xff]   ;;  %v1298_v7 = vpop.permute.xlu0 %1297  ;;  %v1303_v30 = vpop.permute.xlu1 %1302 }
 0x255   :  { %1795 = vmatpush3.bf16.msra.mxu1 %v1273_v6  ;;  %v1910_v6 = vld [vmem:[%s2488_s7 + $0x18] sm:$0xff]  }
 0x256   :  { %v1220_v10 = vadd.f32 %v1685_v8, %v1036_v35  ;;  %v1261_v14 = vmax.f32 %v1217_v59, 0.0 }
 0x258   :  { %v1262_v42 = vmax.f32 %v1220_v10, 0.0  ;;  %v1686_v54 = vpop.f32.mrb[16].mxu1  ;;  %v1308_v59 = vpop.permute.xlu0 %1307 }
 0x259   :  { %v1687_v63 = vpop.f32.mrb[17].mxu1  ;;  %v1313_v8 = vpop.permute.xlu1 %1312 }
 0x25a   :  { %v1688_v9 = vadd.f32 %v1687_v63, %v1686_v54  ;;  %v1689_v11 = vpop.f32.mrb[18].mxu1  ;;  %v1274_v12 = vpack.c.bf16 %v1262_v42, %v1261_v14 }
 0x25b   :  { %v1690_v17 = vpop.f32.mrb[19].mxu1 }
 0x25c   :  { %v1225_v18 = vadd.f32 %v1688_v9, %v1041_v15  ;;  %v1691_v19 = vadd.f32 %v1690_v17, %v1689_v11  ;;  %1796 = vmatprep.subr.bf16.mxu1 %v1274_v12  ;;  %v1443_v35 = vpop.permute.xlu0 %1442 }
 0x25d   :  { %1797 = vmatpush3.bf16.msra.mxu1 %v1274_v12  ;;  %v1448_v10 = vpop.permute.xlu1 %1447 }
 0x25e   :  { %v1228_v21 = vadd.f32 %v1691_v19, %v1046_v20  ;;  %v1263_v22 = vmax.f32 %v1225_v18, 0.0 }
 0x260   :  { %v1264_v23 = vmax.f32 %v1228_v21, 0.0  ;;  %v1692_v24 = vpop.f32.mrb[20].mxu1  ;;  %v1318_v14 = vpop.permute.xlu0 %1317 }
 0x261   :  { %v1693_v25 = vpop.f32.mrb[21].mxu1  ;;  %v1453_v42 = vpop.permute.xlu1 %1452 }
 0x262   :  { %v1694_v26 = vadd.f32 %v1693_v25, %v1692_v24  ;;  %v1695_v27 = vpop.f32.mrb[22].mxu1  ;;  %v1275_v28 = vpack.c.bf16 %v1264_v23, %v1263_v22 }
 0x263   :  { %v1696_v32 = vpop.f32.mrb[23].mxu1 }
 0x264   :  { %v1233_v33 = vadd.f32 %v1694_v26, %v1051_v29  ;;  %v1697_v34 = vadd.f32 %v1696_v32, %v1695_v27  ;;  %1798 = vmatprep.subr.bf16.mxu1 %v1275_v28  ;;  %v1323_v54 = vpop.permute.xlu0 %1322 }
 0x265   :  { %1799 = vmatpush3.bf16.msra.mxu1 %v1275_v28  ;;  %v1458_v63 = vpop.permute.xlu1 %1457 }
 0x266   :  { %v1236_v36 = vadd.f32 %v1697_v34, %v1056_v44  ;;  %v1265_v39 = vmax.f32 %v1233_v33, 0.0 }
 0x268   :  { %v1266_v45 = vmax.f32 %v1236_v36, 0.0  ;;  %v1698_v41 = vpop.f32.mrb[24].mxu1  ;;  %v1328_v18 = vpop.permute.xlu0 %1327 }
 0x269   :  { %v1699_v37 = vpop.f32.mrb[25].mxu1  ;;  %v1463_v24 = vpop.permute.xlu1 %1462 }
 0x26a   :  { %v1700_v38 = vadd.f32 %v1699_v37, %v1698_v41  ;;  %v1701_v40 = vpop.f32.mrb[26].mxu1  ;;  %v1276_v43 = vpack.c.bf16 %v1266_v45, %v1265_v39 }
 0x26b   :  { %v1702_v52 = vpop.f32.mrb[27].mxu1 }
 0x26c   :  { %v1241_v47 = vadd.f32 %v1700_v38, %v1061_v46  ;;  %v1703_v48 = vadd.f32 %v1702_v52, %v1701_v40  ;;  %1800 = vmatprep.subr.bf16.mxu1 %v1276_v43  ;;  %v1333_v33 = vpop.permute.xlu0 %1332 }
 0x26d   :  { %1801 = vmatpush3.bf16.msra.mxu1 %v1276_v43  ;;  %v1468_v38 = vpop.permute.xlu1 %1467 }
 0x26e   :  { %v1244_v53 = vadd.f32 %v1703_v48, %v1066_v50  ;;  %v1267_v51 = vmax.f32 %v1241_v47, 0.0 }
 0x270   :  { %v1268_v16 = vmax.f32 %v1244_v53, 0.0  ;;  %v1704_v49 = vpop.f32.mrb[28].mxu1 }
 0x271   :  { %v1705_v55 = vpop.f32.mrb[29].mxu1 }
 0x272   :  { %v1706_v62 = vadd.f32 %v1705_v55, %v1704_v49  ;;  %v1707_v0 = vpop.f32.mrb[30].mxu1  ;;  %v1277_v13 = vpack.c.bf16 %v1268_v16, %v1267_v51 }
 0x273   :  { %v1708_v3 = vpop.f32.mrb[31].mxu1 }
 0x274   :  { %v1249_v60 = vadd.f32 %v1706_v62, %v1071_v1  ;;  %v1709_v58 = vadd.f32 %v1708_v3, %v1707_v0  ;;  %1802 = vmatprep.subr.bf16.mxu1 %v1277_v13  ;;  %v1473_v62 = vpop.permute.xlu0 %1472 }
 0x275   :  { %1803 = vmatpush3.bf16.msra.mxu1 %v1277_v13 }
 0x276   :  { %v1252_v4 = vadd.f32 %v1709_v58, %v1076_v56  ;;  %v1269_v61 = vmax.f32 %v1249_v60, 0.0  ;;  %v1478_v60 = vpop.permute.xlu1 %1477 }
 0x278   :  { %v1270_v2 = vmax.f32 %v1252_v4, 0.0 }
 0x27a   :  { %v1278_v31 = vpack.c.bf16 %v1270_v2, %v1269_v61 }
 0x27c   :  { %1804 = vmatprep.subr.bf16.mxu1 %v1278_v31 }
 0x27d   :  { %1805 = vmatpush3.bf16.msra.mxu1 %v1278_v31 }
 0x280   :  { %1807 = vmatmul.mubr.bf16.vlgmr.msra.gmra.mrb[32].mxu1 %v1908_v57 }
 0x281   :  { %1810 = vmatprep.mubr.bf16.mxu1 %v1909_v5 }
 0x288   :  { %1811 = vmatmul.mubr.bf16.gmra.mrb[36].mxu1 %v1910_v6 }
 0x353   :  { %v1808_v9 = vpop.f32.mrb[32].mxu1 }
 0x354   :  { %v1402_v11 = vadd.f32 %v1808_v9, %v1308_v59  ;;  %v1393_v12 = vpop.f32.mrb[33].mxu1 }
 0x355   :  { %v1394_v15 = vadd.f32 %v1393_v12, %v1298_v7  ;;  %v1809_v17 = vpop.f32.mrb[34].mxu1 }
 0x356   :  { %v1405_v19 = vadd.f32 %v1809_v17, %v1313_v8  ;;  %v1396_v20 = vpop.f32.mrb[35].mxu1  ;;  %v1426_v21 = vmax.f32 %v1402_v11, 0.0 }
 0x357   :  { %v1424_v22 = vmax.f32 %v1394_v15, 0.0  ;;  %v1397_v23 = vadd.f32 %v1396_v20, %v1303_v30 }
 0x358   :  { %v1427_v26 = vmax.f32 %v1405_v19, 0.0  ;;  %v1482_v28 = vmul.f32 %v1453_v42, %v1426_v21 }
 0x359   :  { %v1480_v25 = vmul.f32 %v1443_v35, %v1424_v22  ;;  %v1425_v27 = vmax.f32 %v1397_v23, 0.0  ;;  %v1510_v35 = vstv %s2491_s10 }
 0x35a   :  { %v1483_v39 = vmul.f32 %v1458_v63, %v1427_v26  ;;  %v1491_v52 = vsel %vm190_vm1, %v1482_v28, 0.0 }
 0x35b   :  { %v1481_v29 = vmul.f32 %v1448_v10, %v1425_v27  ;;  %v1812_v32 = vpop.f32.mrb[36].mxu1  ;;  %v1488_v36 = vsel %vm190_vm1, %v1480_v25, 0.0 }
 0x35c   :  { %v1418_v34 = vadd.f32 %v1812_v32, %v1328_v18  ;;  %v1409_v44 = vpop.f32.mrb[37].mxu1  ;;  %v1493_v51 = vsel %vm190_vm1, %v1483_v39, 0.0 }
 0x35d   :  { %v1489_v45 = vsel %vm190_vm1, %v1481_v29, 0.0  ;;  %v1410_v41 = vadd.f32 %v1409_v44, %v1318_v14  ;;  %v1813_v37 = vpop.f32.mrb[38].mxu1 }
 0x35e   :  { %v1490_v40 = vadd.f32 %v1489_v45, %v1488_v36  ;;  %v1421_v43 = vadd.f32 %v1813_v37, %v1333_v33  ;;  %v1412_v46 = vpop.f32.mrb[39].mxu1  ;;  %v1430_v47 = vmax.f32 %v1418_v34, 0.0 }
 0x35f   :  { %v1428_v48 = vmax.f32 %v1410_v41, 0.0  ;;  %v1413_v50 = vadd.f32 %v1412_v46, %v1323_v54 }
 0x360   :  { %v1492_v53 = vadd.f32 %v1491_v52, %v1490_v40  ;;  %v1431_v49 = vmax.f32 %v1421_v43, 0.0  ;;  %v1486_v13 = vmul.f32 %v1473_v62, %v1430_v47 }
 0x361   :  { %v1484_v16 = vmul.f32 %v1463_v24, %v1428_v48  ;;  %v1429_v55 = vmax.f32 %v1413_v50, 0.0 }
 0x362   :  { %v1494_v0 = vadd.f32 %v1493_v51, %v1492_v53  ;;  %v1487_v56 = vmul.f32 %v1478_v60, %v1431_v49  ;;  %v1499_v2 = vsel %vm190_vm1, %v1486_v13, 0.0 }
 0x363   :  { %v1495_v1 = vsel %vm190_vm1, %v1484_v16, 0.0  ;;  %v1485_v3 = vmul.f32 %v1468_v38, %v1429_v55 }
 0x364   :  { %v1496_v58 = vadd.f32 %v1495_v1, %v1494_v0  ;;  %v1501_v57 = vsel %vm190_vm1, %v1487_v56, 0.0 }
 0x365   :  { %v1497_v4 = vsel %vm190_vm1, %v1485_v3, 0.0 }
 0x366   :  { %v1498_v61 = vadd.f32 %v1497_v4, %v1496_v58 }
 0x368   :  { %v1500_v31 = vadd.f32 %v1499_v2, %v1498_v61 }
 0x36a   :  { %v1502_v5 = vadd.f32 %v1501_v57, %v1500_v31 }
 0x36c   :  { %v1503_v6 = vrot.slane %v1502_v5, 4 }
 0x36e   :  { %v1504_v7 = vadd.f32 %v1503_v6, %v1502_v5 }
 0x370   :  { %v1505_v30 = vrot.slane %v1504_v7, 2 }
 0x372   :  { %v1506_v59 = vadd.f32 %v1505_v30, %v1504_v7 }
 0x374   :  { %v1507_v8 = vrot.slane %v1506_v59, 1 }
 0x376   :  { %v1508_v10 = vadd.f32 %v1507_v8, %v1506_v59 }
 0x378   :  { %v1511_v14 = vadd.f32 %v1510_v35, %v1508_v10 }
 0x37a   :  { %1513 = vst.msk [vmem:[#allocation3] sm:$0x1] %vm1512_vm3, %v1511_v14 }
 0x37b   :  { %1922 = shalt.err (!%p1919_p4)
}
 0x37c   :  { %s1923_s3 = scalar_lea.hbm %s2492_s11, 16 }
 0x37d   :  { %p1924_p5 = scmp.ne.s32.totalorder %s2492_s11, %s1923_s3  ;;  %p1927_p6 = scmp.lt.u32.totalorder %s1923_s3, %s2492_s11 }
 0x37f   :  { %p1929_p7 = pnand %p1927_p6, %p1924_p5 }
 0x381   :  { %1932 = shalt.err (!%p1929_p7)
}
 0x382   :  { %1523 = dma.vmem_to_hbm [thread:$0]  %s1521_s24, 16, %s2492_s11, [#allocation4]  }
 0x383   :  { %1933 = dma.done.wait [#allocation4], 16  }
 0x384   :  { %1934 = vsyncadd [#allocation4], 4294967280 }
 0x385   :  { %1527 = vsyncpa [#allocation4], 1 }

</bundles_post_ra>
